<compile_context>
chip_gen: v7x
topology: tpu7x:2x2x1
jax: 0.10.0
libtpu: 0.0.40
codegen_flags: <defaults>
</compile_context>

<pallas_src>
import functools

import jax
import jax.numpy as jnp
from jax.experimental import pallas as pl
from jax.experimental.pallas import tpu as pltpu


def _round_up(v, m):
    return ((v + m - 1) // m) * m


def pointhop_kernel(x_ref, ctr_ref, o_ref):
    # x_ref: (3, K, tm)   neighbor coords, points on lanes, K on sublanes
    # ctr_ref: (3, tm)    query-point centers
    # o_ref: (32, tm)     grouped output rows (see header comment)
    K = x_ref.shape[1]
    tm = x_ref.shape[2]
    # Per-coordinate reads: never materialize the whole (3, K, tm) tile at once.
    x0 = x_ref[0]                                          # (K, tm)
    x1 = x_ref[1]
    x2 = x_ref[2]

    # Per-coordinate totals; reused for the std AND to derive octant 7 for free.
    s0 = jnp.sum(x0, axis=0, keepdims=True)                # (1, tm)
    s1 = jnp.sum(x1, axis=0, keepdims=True)
    s2 = jnp.sum(x2, axis=0, keepdims=True)
    m0, m1, m2 = s0 * (1.0 / K), s1 * (1.0 / K), s2 * (1.0 / K)

    # Unbiased std over the K neighbors (matches torch.std default, ddof=1).
    # TODO(synk): K == 1 yields nan here, identical to torch.std(ddof=1).
    inv_km1 = (1.0 / (K - 1)) if K > 1 else float("nan")
    std0 = jnp.sqrt(jnp.sum((x0 - m0) ** 2, axis=0, keepdims=True) * inv_km1)
    std1 = jnp.sqrt(jnp.sum((x1 - m1) ** 2, axis=0, keepdims=True) * inv_km1)
    std2 = jnp.sqrt(jnp.sum((x2 - m2) ** 2, axis=0, keepdims=True) * inv_km1)

    # Header group: ONE aligned 8-sublane store instead of 6 masked row stores.
    pad2 = jnp.zeros((2, tm), jnp.float32)
    o_ref[0:8, :] = jnp.concatenate([std0, std1, std2, ctr_ref[...], pad2], axis=0)

    # Octant sign masks (exact 0/1 products, no float-index equality tests).
    px = (x0 > 0).astype(jnp.float32)
    nx = 1.0 - px
    py = (x1 > 0).astype(jnp.float32)
    ny = 1.0 - py
    pz = (x2 > 0).astype(jnp.float32)
    nz = 1.0 - pz
    xy = (nx * ny, nx * py, px * ny, px * py)              # indexed by octant >> 1
    zz = (nz, pz)                                          # indexed by octant & 1

    # scatter_mean over 8 octants; octant 7 derived from totals (saves 1/8 of the
    # mask builds, mask*x multiplies and sublane reductions).
    cnts = []
    sums = ([], [], [])
    for o in range(7):
        mask = xy[o >> 1] * zz[o & 1]                      # (K, tm)
        cnts.append(jnp.sum(mask, axis=0, keepdims=True))
        sums[0].append(jnp.sum(mask * x0, axis=0, keepdims=True))
        sums[1].append(jnp.sum(mask * x1, axis=0, keepdims=True))
        sums[2].append(jnp.sum(mask * x2, axis=0, keepdims=True))
    cnts.append(float(K) - sum(cnts))                      # exact (counts are small ints)
    totals = (s0, s1, s2)
    for c in range(3):
        sums[c].append(totals[c] - sum(sums[c]))

    cnt = jnp.concatenate(cnts, axis=0)                    # (8, tm)
    inv = jnp.where(cnt > 0, 1.0 / jnp.maximum(cnt, 1.0), 0.0)

    # Three aligned 8-sublane grouped stores (x/y/z means of all 8 octants).
    for c in range(3):
        o_ref[8 + 8 * c:16 + 8 * c, :] = jnp.concatenate(sums[c], axis=0) * inv


@functools.partial(jax.jit, static_argnames=("tm",))
def pointhop_forward(group_xyz, new_xyz, tm=None):
    """group_xyz: (B, 3, N, K)  new_xyz: (B, N, 3)  ->  (B, N, 30)"""
    B, C, N, K = group_xyz.shape
    assert C == 3
    M = B * N

    # ---- tile sizing: biggest tile a conservative VMEM budget allows ----
    auto = tm is None
    if auto:
        # Rough per-lane bytes: double-buffered x/ctr/out blocks plus the K-scaled
        # elementwise temporaries (sign masks, octant masks, mask*x).
        bytes_per_lane = 4 * (18 * K + 128)
        budget = 16 * 1024 * 1024            # leaves large headroom on v7x's 64 MiB VMEM
        tm = max(128, min(8192, (budget // bytes_per_lane) // 128 * 128))
    tm = _round_up(tm, 128)
    m_lanes = _round_up(M, 128)
    if auto and m_lanes >= 4 * 1024:
        # Keep >= 4 grid steps (>= 2 per v7x TensorCore) when each step stays >= 1024
        # lanes; otherwise one big tile wins (per-step overhead dominates this kernel).
        tm = min(tm, _round_up(pl.cdiv(M, 4), 128))
    tm = min(tm, m_lanes)

    # ---- layout: points on the 128-lane axis, K on sublanes ----
    x_ckm = jnp.transpose(group_xyz, (1, 3, 0, 2)).reshape(C, K, M).astype(jnp.float32)
    ctr = jnp.transpose(new_xyz.reshape(M, 3).astype(jnp.float32), (1, 0))   # (3, M)

    # Pad only to the 128-lane minimum (no-op for the common M % 128 == 0 case).
    m_pad = m_lanes
    if m_pad != M:
        x_ckm = jnp.pad(x_ckm, ((0, 0), (0, 0), (0, m_pad - M)))
        ctr = jnp.pad(ctr, ((0, 0), (0, m_pad - M)))

    grid = pl.cdiv(m_pad, tm)   # trailing partial block allowed; padded lanes sliced below
    out = pl.pallas_call(
        pointhop_kernel,
        out_shape=jax.ShapeDtypeStruct((32, m_pad), jnp.float32),
        grid=(grid,),
        in_specs=[
            pl.BlockSpec((3, K, tm), lambda i: (0, 0, i)),
            pl.BlockSpec((3, tm), lambda i: (0, i)),
        ],
        out_specs=pl.BlockSpec((32, tm), lambda i: (0, i)),
        compiler_params=pltpu.CompilerParams(
            dimension_semantics=("parallel",),
            vmem_limit_bytes=48 * 1024 * 1024),
    )(x_ckm, ctr)

    # Undo the row grouping inside the (32, M) -> (M, 30) transpose (one fused pass):
    # final row 6 + 3*o + c  <-  kernel row 8 + 8*c + o.
    perm = list(range(6)) + [8 + 8 * c + o for o in range(8) for c in range(3)]
    feats = jnp.take(out[:, :M], jnp.asarray(perm, dtype=jnp.int32), axis=0)   # (30, M)
    return jnp.transpose(feats, (1, 0)).reshape(B, N, 30)


def pointhop_reference(group_xyz, new_xyz):
    """Pure-JAX reference mirroring the PyTorch forward exactly."""
    B, C, N, K = group_xyz.shape
    X = jnp.transpose(group_xyz, (0, 2, 3, 1)).reshape(B * N, K, C)
    std_xyz = jnp.std(X, axis=1, ddof=1)
    center = new_xyz.reshape(B * N, 3)
    idx = ((X[:, :, 0] > 0).astype(jnp.int32) * 4
           + (X[:, :, 1] > 0).astype(jnp.int32) * 2
           + (X[:, :, 2] > 0).astype(jnp.int32))
    octs = []
    for o in range(8):
        mask = (idx == o).astype(jnp.float32)[:, :, None]
        cnt = mask.sum(axis=1)
        s = (mask * X).sum(axis=1)
        octs.append(jnp.where(cnt > 0, s / jnp.maximum(cnt, 1.0), 0.0))
    cur = jnp.stack(octs, axis=1).reshape(B * N, 24)
    return jnp.concatenate([std_xyz, center, cur], axis=-1).reshape(B, N, -1)


if __name__ == "__main__":
    # PointHop has no learnable parameters (outchannel = 6 + 24 = 30), so there is
    # nothing to initialize beyond the inputs.
    key = jax.random.PRNGKey(0)
    k1, k2, k3, k4 = jax.random.split(key, 4)

    B, N, K = 2, 16, 8
    group_xyz = jax.random.normal(k1, (B, 3, N, K), dtype=jnp.float32)   # (B, C, N, K)
    new_xyz = jax.random.normal(k2, (B, N, 3), dtype=jnp.float32)

    out = jax.block_until_ready(pointhop_forward(group_xyz, new_xyz))
    ref = pointhop_reference(group_xyz, new_xyz)
    assert out.shape == (B, N, 30), out.shape
    assert jnp.allclose(out, ref, atol=1e-4, rtol=1e-4), float(jnp.abs(out - ref).max())

    # Second tiny shape: multi-step grid + lane padding (M = 320 -> 384 padded, tm=128).
    B2, N2, K2 = 2, 160, 8
    gx2 = jax.random.normal(k3, (B2, 3, N2, K2), dtype=jnp.float32)
    nx2 = jax.random.normal(k4, (B2, N2, 3), dtype=jnp.float32)
    out2 = jax.block_until_ready(pointhop_forward(gx2, nx2, tm=128))
    ref2 = pointhop_reference(gx2, nx2)
    assert out2.shape == (B2, N2, 30), out2.shape
    assert jnp.allclose(out2, ref2, atol=1e-4, rtol=1e-4), float(jnp.abs(out2 - ref2).max())

    print("KERNEL_OK")
</pallas_src>

<mosaic_0001>
module attributes {stable_mosaic.version = 11 : i64} {
  func.func @pointhop_kernel(%arg0: i32, %arg1: memref<3x8x128xf32, #tpu.memory_space<vmem>>, %arg2: memref<3x128xf32, #tpu.memory_space<vmem>>, %arg3: memref<32x128xf32, #tpu.memory_space<vmem>>) attributes {dimension_semantics = [#tpu.dimension_semantics<parallel>], iteration_bounds = array<i64: 1>, scalar_prefetch = 0 : i64, scratch_operands = 0 : i64, tpu.core_type = #tpu.core_type<tc>, window_params = [{transform_indices = @transform_0, window_bounds = array<i64: 3, 8, 128>}, {transform_indices = @transform_1, window_bounds = array<i64: 3, 128>}, {transform_indices = @transform_2, window_bounds = array<i64: 32, 128>}]} {
    %c0 = arith.constant 0 : index
    %c0_0 = arith.constant 0 : index
    %c0_1 = arith.constant 0 : index
    %0 = vector.load %arg1[%c0, %c0_0, %c0_1] : memref<3x8x128xf32, #tpu.memory_space<vmem>>, vector<1x8x128xf32>
    %1 = vector.shape_cast %0 : vector<1x8x128xf32> to vector<8x128xf32>
    %c1 = arith.constant 1 : index
    %c0_2 = arith.constant 0 : index
    %c0_3 = arith.constant 0 : index
    %2 = vector.load %arg1[%c1, %c0_2, %c0_3] : memref<3x8x128xf32, #tpu.memory_space<vmem>>, vector<1x8x128xf32>
    %3 = vector.shape_cast %2 : vector<1x8x128xf32> to vector<8x128xf32>
    %c2 = arith.constant 2 : index
    %c0_4 = arith.constant 0 : index
    %c0_5 = arith.constant 0 : index
    %4 = vector.load %arg1[%c2, %c0_4, %c0_5] : memref<3x8x128xf32, #tpu.memory_space<vmem>>, vector<1x8x128xf32>
    %5 = vector.shape_cast %4 : vector<1x8x128xf32> to vector<8x128xf32>
    %cst = arith.constant dense<0.000000e+00> : vector<128xf32>
    %6 = vector.multi_reduction <add>, %1, %cst [0] : vector<8x128xf32> to vector<128xf32>
    %7 = vector.shape_cast %6 : vector<128xf32> to vector<1x128xf32>
    %cst_6 = arith.constant dense<0.000000e+00> : vector<128xf32>
    %8 = vector.multi_reduction <add>, %3, %cst_6 [0] : vector<8x128xf32> to vector<128xf32>
    %9 = vector.shape_cast %8 : vector<128xf32> to vector<1x128xf32>
    %cst_7 = arith.constant dense<0.000000e+00> : vector<128xf32>
    %10 = vector.multi_reduction <add>, %5, %cst_7 [0] : vector<8x128xf32> to vector<128xf32>
    %11 = vector.shape_cast %10 : vector<128xf32> to vector<1x128xf32>
    %cst_8 = arith.constant 1.250000e-01 : f32
    %12 = vector.broadcast %cst_8 : f32 to vector<1x128xf32>
    %13 = arith.mulf %7, %12 : vector<1x128xf32>
    %cst_9 = arith.constant 1.250000e-01 : f32
    %14 = vector.broadcast %cst_9 : f32 to vector<1x128xf32>
    %15 = arith.mulf %9, %14 : vector<1x128xf32>
    %cst_10 = arith.constant 1.250000e-01 : f32
    %16 = vector.broadcast %cst_10 : f32 to vector<1x128xf32>
    %17 = arith.mulf %11, %16 : vector<1x128xf32>
    %18 = vector.broadcast %13 : vector<1x128xf32> to vector<8x128xf32>
    %19 = arith.subf %1, %18 : vector<8x128xf32>
    %20 = arith.mulf %19, %19 : vector<8x128xf32>
    %cst_11 = arith.constant dense<0.000000e+00> : vector<128xf32>
    %21 = vector.multi_reduction <add>, %20, %cst_11 [0] : vector<8x128xf32> to vector<128xf32>
    %22 = vector.shape_cast %21 : vector<128xf32> to vector<1x128xf32>
    %cst_12 = arith.constant 0.142857149 : f32
    %23 = vector.broadcast %cst_12 : f32 to vector<1x128xf32>
    %24 = arith.mulf %22, %23 : vector<1x128xf32>
    %25 = math.sqrt %24 : vector<1x128xf32>
    %26 = vector.broadcast %15 : vector<1x128xf32> to vector<8x128xf32>
    %27 = arith.subf %3, %26 : vector<8x128xf32>
    %28 = arith.mulf %27, %27 : vector<8x128xf32>
    %cst_13 = arith.constant dense<0.000000e+00> : vector<128xf32>
    %29 = vector.multi_reduction <add>, %28, %cst_13 [0] : vector<8x128xf32> to vector<128xf32>
    %30 = vector.shape_cast %29 : vector<128xf32> to vector<1x128xf32>
    %cst_14 = arith.constant 0.142857149 : f32
    %31 = vector.broadcast %cst_14 : f32 to vector<1x128xf32>
    %32 = arith.mulf %30, %31 : vector<1x128xf32>
    %33 = math.sqrt %32 : vector<1x128xf32>
    %34 = vector.broadcast %17 : vector<1x128xf32> to vector<8x128xf32>
    %35 = arith.subf %5, %34 : vector<8x128xf32>
    %36 = arith.mulf %35, %35 : vector<8x128xf32>
    %cst_15 = arith.constant dense<0.000000e+00> : vector<128xf32>
    %37 = vector.multi_reduction <add>, %36, %cst_15 [0] : vector<8x128xf32> to vector<128xf32>
    %38 = vector.shape_cast %37 : vector<128xf32> to vector<1x128xf32>
    %cst_16 = arith.constant 0.142857149 : f32
    %39 = vector.broadcast %cst_16 : f32 to vector<1x128xf32>
    %40 = arith.mulf %38, %39 : vector<1x128xf32>
    %41 = math.sqrt %40 : vector<1x128xf32>
    %cst_17 = arith.constant 0.000000e+00 : f32
    %42 = vector.broadcast %cst_17 : f32 to vector<2x128xf32>
    %c0_18 = arith.constant 0 : index
    %c0_19 = arith.constant 0 : index
    %43 = vector.load %arg2[%c0_18, %c0_19] : memref<3x128xf32, #tpu.memory_space<vmem>>, vector<3x128xf32>
    %44 = tpu.concatenate %25, %33, %41, %43, %42 in 0 : vector<1x128xf32>, vector<1x128xf32>, vector<1x128xf32>, vector<3x128xf32>, vector<2x128xf32> -> vector<8x128xf32>
    %c0_20 = arith.constant 0 : index
    %c0_21 = arith.constant 0 : index
    %45 = vector.load %arg3[%c0_20, %c0_21] : memref<32x128xf32, #tpu.memory_space<vmem>>, vector<8x128xf32>
    tpu.vector_store %arg3[%c0_20, %c0_21], %44 {strides = array<i32>} : memref<32x128xf32, #tpu.memory_space<vmem>>, vector<8x128xf32>,
    %cst_22 = arith.constant 0.000000e+00 : f32
    %46 = vector.broadcast %cst_22 : f32 to vector<8x128xf32>
    %47 = arith.cmpf ogt, %1, %46 : vector<8x128xf32>
    %48 = arith.extui %47 : vector<8x128xi1> to vector<8x128xi32>
    %49 = arith.sitofp %48 : vector<8x128xi32> to vector<8x128xf32>
    %cst_23 = arith.constant 1.000000e+00 : f32
    %50 = vector.broadcast %cst_23 : f32 to vector<8x128xf32>
    %51 = arith.subf %50, %49 : vector<8x128xf32>
    %cst_24 = arith.constant 0.000000e+00 : f32
    %52 = vector.broadcast %cst_24 : f32 to vector<8x128xf32>
    %53 = arith.cmpf ogt, %3, %52 : vector<8x128xf32>
    %54 = arith.extui %53 : vector<8x128xi1> to vector<8x128xi32>
    %55 = arith.sitofp %54 : vector<8x128xi32> to vector<8x128xf32>
    %cst_25 = arith.constant 1.000000e+00 : f32
    %56 = vector.broadcast %cst_25 : f32 to vector<8x128xf32>
    %57 = arith.subf %56, %55 : vector<8x128xf32>
    %cst_26 = arith.constant 0.000000e+00 : f32
    %58 = vector.broadcast %cst_26 : f32 to vector<8x128xf32>
    %59 = arith.cmpf ogt, %5, %58 : vector<8x128xf32>
    %60 = arith.extui %59 : vector<8x128xi1> to vector<8x128xi32>
    %61 = arith.sitofp %60 : vector<8x128xi32> to vector<8x128xf32>
    %cst_27 = arith.constant 1.000000e+00 : f32
    %62 = vector.broadcast %cst_27 : f32 to vector<8x128xf32>
    %63 = arith.subf %62, %61 : vector<8x128xf32>
    %64 = arith.mulf %51, %57 : vector<8x128xf32>
    %65 = arith.mulf %51, %55 : vector<8x128xf32>
    %66 = arith.mulf %49, %57 : vector<8x128xf32>
    %67 = arith.mulf %49, %55 : vector<8x128xf32>
    %68 = arith.mulf %64, %63 : vector<8x128xf32>
    %cst_28 = arith.constant dense<0.000000e+00> : vector<128xf32>
    %69 = vector.multi_reduction <add>, %68, %cst_28 [0] : vector<8x128xf32> to vector<128xf32>
    %70 = vector.shape_cast %69 : vector<128xf32> to vector<1x128xf32>
    %71 = arith.mulf %68, %1 : vector<8x128xf32>
    %cst_29 = arith.constant dense<0.000000e+00> : vector<128xf32>
    %72 = vector.multi_reduction <add>, %71, %cst_29 [0] : vector<8x128xf32> to vector<128xf32>
    %73 = vector.shape_cast %72 : vector<128xf32> to vector<1x128xf32>
    %74 = arith.mulf %68, %3 : vector<8x128xf32>
    %cst_30 = arith.constant dense<0.000000e+00> : vector<128xf32>
    %75 = vector.multi_reduction <add>, %74, %cst_30 [0] : vector<8x128xf32> to vector<128xf32>
    %76 = vector.shape_cast %75 : vector<128xf32> to vector<1x128xf32>
    %77 = arith.mulf %68, %5 : vector<8x128xf32>
    %cst_31 = arith.constant dense<0.000000e+00> : vector<128xf32>
    %78 = vector.multi_reduction <add>, %77, %cst_31 [0] : vector<8x128xf32> to vector<128xf32>
    %79 = vector.shape_cast %78 : vector<128xf32> to vector<1x128xf32>
    %80 = arith.mulf %64, %61 : vector<8x128xf32>
    %cst_32 = arith.constant dense<0.000000e+00> : vector<128xf32>
    %81 = vector.multi_reduction <add>, %80, %cst_32 [0] : vector<8x128xf32> to vector<128xf32>
    %82 = vector.shape_cast %81 : vector<128xf32> to vector<1x128xf32>
    %83 = arith.mulf %80, %1 : vector<8x128xf32>
    %cst_33 = arith.constant dense<0.000000e+00> : vector<128xf32>
    %84 = vector.multi_reduction <add>, %83, %cst_33 [0] : vector<8x128xf32> to vector<128xf32>
    %85 = vector.shape_cast %84 : vector<128xf32> to vector<1x128xf32>
    %86 = arith.mulf %80, %3 : vector<8x128xf32>
    %cst_34 = arith.constant dense<0.000000e+00> : vector<128xf32>
    %87 = vector.multi_reduction <add>, %86, %cst_34 [0] : vector<8x128xf32> to vector<128xf32>
    %88 = vector.shape_cast %87 : vector<128xf32> to vector<1x128xf32>
    %89 = arith.mulf %80, %5 : vector<8x128xf32>
    %cst_35 = arith.constant dense<0.000000e+00> : vector<128xf32>
    %90 = vector.multi_reduction <add>, %89, %cst_35 [0] : vector<8x128xf32> to vector<128xf32>
    %91 = vector.shape_cast %90 : vector<128xf32> to vector<1x128xf32>
    %92 = arith.mulf %65, %63 : vector<8x128xf32>
    %cst_36 = arith.constant dense<0.000000e+00> : vector<128xf32>
    %93 = vector.multi_reduction <add>, %92, %cst_36 [0] : vector<8x128xf32> to vector<128xf32>
    %94 = vector.shape_cast %93 : vector<128xf32> to vector<1x128xf32>
    %95 = arith.mulf %92, %1 : vector<8x128xf32>
    %cst_37 = arith.constant dense<0.000000e+00> : vector<128xf32>
    %96 = vector.multi_reduction <add>, %95, %cst_37 [0] : vector<8x128xf32> to vector<128xf32>
    %97 = vector.shape_cast %96 : vector<128xf32> to vector<1x128xf32>
    %98 = arith.mulf %92, %3 : vector<8x128xf32>
    %cst_38 = arith.constant dense<0.000000e+00> : vector<128xf32>
    %99 = vector.multi_reduction <add>, %98, %cst_38 [0] : vector<8x128xf32> to vector<128xf32>
    %100 = vector.shape_cast %99 : vector<128xf32> to vector<1x128xf32>
    %101 = arith.mulf %92, %5 : vector<8x128xf32>
    %cst_39 = arith.constant dense<0.000000e+00> : vector<128xf32>
    %102 = vector.multi_reduction <add>, %101, %cst_39 [0] : vector<8x128xf32> to vector<128xf32>
    %103 = vector.shape_cast %102 : vector<128xf32> to vector<1x128xf32>
    %104 = arith.mulf %65, %61 : vector<8x128xf32>
    %cst_40 = arith.constant dense<0.000000e+00> : vector<128xf32>
    %105 = vector.multi_reduction <add>, %104, %cst_40 [0] : vector<8x128xf32> to vector<128xf32>
    %106 = vector.shape_cast %105 : vector<128xf32> to vector<1x128xf32>
    %107 = arith.mulf %104, %1 : vector<8x128xf32>
    %cst_41 = arith.constant dense<0.000000e+00> : vector<128xf32>
    %108 = vector.multi_reduction <add>, %107, %cst_41 [0] : vector<8x128xf32> to vector<128xf32>
    %109 = vector.shape_cast %108 : vector<128xf32> to vector<1x128xf32>
    %110 = arith.mulf %104, %3 : vector<8x128xf32>
    %cst_42 = arith.constant dense<0.000000e+00> : vector<128xf32>
    %111 = vector.multi_reduction <add>, %110, %cst_42 [0] : vector<8x128xf32> to vector<128xf32>
    %112 = vector.shape_cast %111 : vector<128xf32> to vector<1x128xf32>
    %113 = arith.mulf %104, %5 : vector<8x128xf32>
    %cst_43 = arith.constant dense<0.000000e+00> : vector<128xf32>
    %114 = vector.multi_reduction <add>, %113, %cst_43 [0] : vector<8x128xf32> to vector<128xf32>
    %115 = vector.shape_cast %114 : vector<128xf32> to vector<1x128xf32>
    %116 = arith.mulf %66, %63 : vector<8x128xf32>
    %cst_44 = arith.constant dense<0.000000e+00> : vector<128xf32>
    %117 = vector.multi_reduction <add>, %116, %cst_44 [0] : vector<8x128xf32> to vector<128xf32>
    %118 = vector.shape_cast %117 : vector<128xf32> to vector<1x128xf32>
    %119 = arith.mulf %116, %1 : vector<8x128xf32>
    %cst_45 = arith.constant dense<0.000000e+00> : vector<128xf32>
    %120 = vector.multi_reduction <add>, %119, %cst_45 [0] : vector<8x128xf32> to vector<128xf32>
    %121 = vector.shape_cast %120 : vector<128xf32> to vector<1x128xf32>
    %122 = arith.mulf %116, %3 : vector<8x128xf32>
    %cst_46 = arith.constant dense<0.000000e+00> : vector<128xf32>
    %123 = vector.multi_reduction <add>, %122, %cst_46 [0] : vector<8x128xf32> to vector<128xf32>
    %124 = vector.shape_cast %123 : vector<128xf32> to vector<1x128xf32>
    %125 = arith.mulf %116, %5 : vector<8x128xf32>
    %cst_47 = arith.constant dense<0.000000e+00> : vector<128xf32>
    %126 = vector.multi_reduction <add>, %125, %cst_47 [0] : vector<8x128xf32> to vector<128xf32>
    %127 = vector.shape_cast %126 : vector<128xf32> to vector<1x128xf32>
    %128 = arith.mulf %66, %61 : vector<8x128xf32>
    %cst_48 = arith.constant dense<0.000000e+00> : vector<128xf32>
    %129 = vector.multi_reduction <add>, %128, %cst_48 [0] : vector<8x128xf32> to vector<128xf32>
    %130 = vector.shape_cast %129 : vector<128xf32> to vector<1x128xf32>
    %131 = arith.mulf %128, %1 : vector<8x128xf32>
    %cst_49 = arith.constant dense<0.000000e+00> : vector<128xf32>
    %132 = vector.multi_reduction <add>, %131, %cst_49 [0] : vector<8x128xf32> to vector<128xf32>
    %133 = vector.shape_cast %132 : vector<128xf32> to vector<1x128xf32>
    %134 = arith.mulf %128, %3 : vector<8x128xf32>
    %cst_50 = arith.constant dense<0.000000e+00> : vector<128xf32>
    %135 = vector.multi_reduction <add>, %134, %cst_50 [0] : vector<8x128xf32> to vector<128xf32>
    %136 = vector.shape_cast %135 : vector<128xf32> to vector<1x128xf32>
    %137 = arith.mulf %128, %5 : vector<8x128xf32>
    %cst_51 = arith.constant dense<0.000000e+00> : vector<128xf32>
    %138 = vector.multi_reduction <add>, %137, %cst_51 [0] : vector<8x128xf32> to vector<128xf32>
    %139 = vector.shape_cast %138 : vector<128xf32> to vector<1x128xf32>
    %140 = arith.mulf %67, %63 : vector<8x128xf32>
    %cst_52 = arith.constant dense<0.000000e+00> : vector<128xf32>
    %141 = vector.multi_reduction <add>, %140, %cst_52 [0] : vector<8x128xf32> to vector<128xf32>
    %142 = vector.shape_cast %141 : vector<128xf32> to vector<1x128xf32>
    %143 = arith.mulf %140, %1 : vector<8x128xf32>
    %cst_53 = arith.constant dense<0.000000e+00> : vector<128xf32>
    %144 = vector.multi_reduction <add>, %143, %cst_53 [0] : vector<8x128xf32> to vector<128xf32>
    %145 = vector.shape_cast %144 : vector<128xf32> to vector<1x128xf32>
    %146 = arith.mulf %140, %3 : vector<8x128xf32>
    %cst_54 = arith.constant dense<0.000000e+00> : vector<128xf32>
    %147 = vector.multi_reduction <add>, %146, %cst_54 [0] : vector<8x128xf32> to vector<128xf32>
    %148 = vector.shape_cast %147 : vector<128xf32> to vector<1x128xf32>
    %149 = arith.mulf %140, %5 : vector<8x128xf32>
    %cst_55 = arith.constant dense<0.000000e+00> : vector<128xf32>
    %150 = vector.multi_reduction <add>, %149, %cst_55 [0] : vector<8x128xf32> to vector<128xf32>
    %151 = vector.shape_cast %150 : vector<128xf32> to vector<1x128xf32>
    %cst_56 = arith.constant 0.000000e+00 : f32
    %152 = vector.broadcast %cst_56 : f32 to vector<1x128xf32>
    %153 = arith.addf %152, %70 : vector<1x128xf32>
    %154 = arith.addf %153, %82 : vector<1x128xf32>
    %155 = arith.addf %154, %94 : vector<1x128xf32>
    %156 = arith.addf %155, %106 : vector<1x128xf32>
    %157 = arith.addf %156, %118 : vector<1x128xf32>
    %158 = arith.addf %157, %130 : vector<1x128xf32>
    %159 = arith.addf %158, %142 : vector<1x128xf32>
    %cst_57 = arith.constant 8.000000e+00 : f32
    %160 = vector.broadcast %cst_57 : f32 to vector<1x128xf32>
    %161 = arith.subf %160, %159 : vector<1x128xf32>
    %cst_58 = arith.constant 0.000000e+00 : f32
    %162 = vector.broadcast %cst_58 : f32 to vector<1x128xf32>
    %163 = arith.addf %162, %73 : vector<1x128xf32>
    %164 = arith.addf %163, %85 : vector<1x128xf32>
    %165 = arith.addf %164, %97 : vector<1x128xf32>
    %166 = arith.addf %165, %109 : vector<1x128xf32>
    %167 = arith.addf %166, %121 : vector<1x128xf32>
    %168 = arith.addf %167, %133 : vector<1x128xf32>
    %169 = arith.addf %168, %145 : vector<1x128xf32>
    %170 = arith.subf %7, %169 : vector<1x128xf32>
    %cst_59 = arith.constant 0.000000e+00 : f32
    %171 = vector.broadcast %cst_59 : f32 to vector<1x128xf32>
    %172 = arith.addf %171, %76 : vector<1x128xf32>
    %173 = arith.addf %172, %88 : vector<1x128xf32>
    %174 = arith.addf %173, %100 : vector<1x128xf32>
    %175 = arith.addf %174, %112 : vector<1x128xf32>
    %176 = arith.addf %175, %124 : vector<1x128xf32>
    %177 = arith.addf %176, %136 : vector<1x128xf32>
    %178 = arith.addf %177, %148 : vector<1x128xf32>
    %179 = arith.subf %9, %178 : vector<1x128xf32>
    %cst_60 = arith.constant 0.000000e+00 : f32
    %180 = vector.broadcast %cst_60 : f32 to vector<1x128xf32>
    %181 = arith.addf %180, %79 : vector<1x128xf32>
    %182 = arith.addf %181, %91 : vector<1x128xf32>
    %183 = arith.addf %182, %103 : vector<1x128xf32>
    %184 = arith.addf %183, %115 : vector<1x128xf32>
    %185 = arith.addf %184, %127 : vector<1x128xf32>
    %186 = arith.addf %185, %139 : vector<1x128xf32>
    %187 = arith.addf %186, %151 : vector<1x128xf32>
    %188 = arith.subf %11, %187 : vector<1x128xf32>
    %189 = tpu.concatenate %70, %82, %94, %106, %118, %130, %142, %161 in 0 : vector<1x128xf32>, vector<1x128xf32>, vector<1x128xf32>, vector<1x128xf32>, vector<1x128xf32>, vector<1x128xf32>, vector<1x128xf32>, vector<1x128xf32> -> vector<8x128xf32>
    %cst_61 = arith.constant 0.000000e+00 : f32
    %190 = vector.broadcast %cst_61 : f32 to vector<8x128xf32>
    %191 = arith.cmpf ogt, %189, %190 : vector<8x128xf32>
    %cst_62 = arith.constant 1.000000e+00 : f32
    %192 = vector.broadcast %cst_62 : f32 to vector<8x128xf32>
    %193 = arith.maximumf %189, %192 : vector<8x128xf32>
    %cst_63 = arith.constant 1.000000e+00 : f32
    %194 = vector.broadcast %cst_63 : f32 to vector<8x128xf32>
    %195 = arith.divf %194, %193 : vector<8x128xf32>
    %cst_64 = arith.constant 0.000000e+00 : f32
    %196 = vector.broadcast %cst_64 : f32 to vector<8x128xf32>
    %197 = arith.select %191, %195, %196 : vector<8x128xi1>, vector<8x128xf32>
    %198 = tpu.concatenate %73, %85, %97, %109, %121, %133, %145, %170 in 0 : vector<1x128xf32>, vector<1x128xf32>, vector<1x128xf32>, vector<1x128xf32>, vector<1x128xf32>, vector<1x128xf32>, vector<1x128xf32>, vector<1x128xf32> -> vector<8x128xf32>
    %199 = arith.mulf %198, %197 : vector<8x128xf32>
    %c8 = arith.constant 8 : index
    %c0_65 = arith.constant 0 : index
    %200 = vector.load %arg3[%c8, %c0_65] : memref<32x128xf32, #tpu.memory_space<vmem>>, vector<8x128xf32>
    tpu.vector_store %arg3[%c8, %c0_65], %199 {strides = array<i32>} : memref<32x128xf32, #tpu.memory_space<vmem>>, vector<8x128xf32>,
    %201 = tpu.concatenate %76, %88, %100, %112, %124, %136, %148, %179 in 0 : vector<1x128xf32>, vector<1x128xf32>, vector<1x128xf32>, vector<1x128xf32>, vector<1x128xf32>, vector<1x128xf32>, vector<1x128xf32>, vector<1x128xf32> -> vector<8x128xf32>
    %202 = arith.mulf %201, %197 : vector<8x128xf32>
    %c16 = arith.constant 16 : index
    %c0_66 = arith.constant 0 : index
    %203 = vector.load %arg3[%c16, %c0_66] : memref<32x128xf32, #tpu.memory_space<vmem>>, vector<8x128xf32>
    tpu.vector_store %arg3[%c16, %c0_66], %202 {strides = array<i32>} : memref<32x128xf32, #tpu.memory_space<vmem>>, vector<8x128xf32>,
    %204 = tpu.concatenate %79, %91, %103, %115, %127, %139, %151, %188 in 0 : vector<1x128xf32>, vector<1x128xf32>, vector<1x128xf32>, vector<1x128xf32>, vector<1x128xf32>, vector<1x128xf32>, vector<1x128xf32>, vector<1x128xf32> -> vector<8x128xf32>
    %205 = arith.mulf %204, %197 : vector<8x128xf32>
    %c24 = arith.constant 24 : index
    %c0_67 = arith.constant 0 : index
    %206 = vector.load %arg3[%c24, %c0_67] : memref<32x128xf32, #tpu.memory_space<vmem>>, vector<8x128xf32>
    tpu.vector_store %arg3[%c24, %c0_67], %205 {strides = array<i32>} : memref<32x128xf32, #tpu.memory_space<vmem>>, vector<8x128xf32>,
    return
  }
  func.func @transform_0(%arg0: i32) -> (i32, i32, i32) {
    %c0_i32 = arith.constant 0 : i32
    %c0_i32_0 = arith.constant 0 : i32
    %c0_i32_1 = arith.constant 0 : i32
    return %c0_i32, %c0_i32_0, %arg0 : i32, i32, i32
  }
  func.func @transform_1(%arg0: i32) -> (i32, i32) {
    %c0_i32 = arith.constant 0 : i32
    %c0_i32_0 = arith.constant 0 : i32
    return %c0_i32, %arg0 : i32, i32
  }
  func.func @transform_2(%arg0: i32) -> (i32, i32) {
    %c0_i32 = arith.constant 0 : i32
    %c0_i32_0 = arith.constant 0 : i32
    return %c0_i32, %arg0 : i32, i32
  }
}

</mosaic_0001>

<bundles_post_ra>
// kernel: pointhop_forward.1
= control target key start
LH: loop header
LB: loop body
LE: loop exit
PB: predicated region body
PF: predicated region fallthrough
CT: control target
= control target key end

     0   :  { %v402_v6 = vmov 0.0   ;;  %vm89_vm9 = vcmask 1040384   ;;  %vm91_vm10 = vcmask 1041408   ;;  %vm93_vm11 = vcmask 1042432   ;;  %s693_s0 = inlined_call_operand.vmem [shape: f32[3,8,128], index: 0, kind: input, shape index: {}]   ;;  %s694_s1 = inlined_call_operand.vmem [shape: f32[3,128], index: 1, kind: input, shape index: {}]   ;;  %s695_s2 = inlined_call_operand.vmem [shape: f32[32,128], index: 2, kind: output, shape index: {}]  }
   0x1   :  { %v421_v0 = vld [vmem:[%s693_s0] sm:$0xff]  ;;  %v426_v1 = vld [vmem:[%s693_s0 + $0x8] sm:$0xff]  ;;  %v431_v2 = vld [vmem:[%s693_s0 + $0x10] sm:$0xff]  ;;  %vm95_vm12 = vcmask 1045504   ;;  %vm345_vm13 = vcmask 1043456   ;;  %vm347_vm14 = vcmask 1044480  }
   0x2   :  { %v16_v3 = vrot.slane %v421_v0, 4  ;;  %v22_v4 = vrot.slane %v426_v1, 4  ;;  %v28_v5 = vrot.slane %v431_v2, 4  ;;  %vm98_vm0 = vcmp.gt.f32.partialorder %v421_v0, 0.0  ;;  %v484_v50 = vld [vmem:[%s694_s1] sm:$0x7] }
   0x3   :  { %v437_v7 = vsel %vm98_vm0, 1.0, %v402_v6  ;;  %vm102_vm1 = vcmp.gt.f32.partialorder %v426_v1, 0.0  ;;  %vm106_vm2 = vcmp.gt.f32.partialorder %v431_v2, 0.0  ;;  %vm350_vm15 = vcmask 1046528  }
   0x4   :  { %v17_v8 = vadd.f32 %v16_v3, %v421_v0  ;;  %v23_v9 = vadd.f32 %v426_v1, %v22_v4  ;;  %v29_v10 = vadd.f32 %v431_v2, %v28_v5  ;;  %v101_v11 = vsub.f32 1.0, %v437_v7 }
   0x5   :  { %v445_v12 = vsel %vm102_vm1, 1.0, %v402_v6  ;;  %v447_v13 = vsel %vm106_vm2, 1.0, %v402_v6  ;;  %v87_v5 = vrot.slane %v484_v50, 5 }
   0x6   :  { %v18_v14 = vrot.slane %v17_v8, 2  ;;  %v24_v15 = vrot.slane %v23_v9, 2  ;;  %v30_v16 = vrot.slane %v29_v10, 2  ;;  %v105_v17 = vsub.f32 1.0, %v445_v12 }
   0x7   :  { %v451_v18 = vsub.f32 1.0, %v447_v13  ;;  %v454_v19 = vmul.f32 %v445_v12, %v101_v11  ;;  %v113_v6 = vmul.f32 %v445_v12, %v437_v7 }
   0x8   :  { %v19_v20 = vadd.f32 %v18_v14, %v17_v8  ;;  %v25_v21 = vadd.f32 %v24_v15, %v23_v9  ;;  %v31_v22 = vadd.f32 %v30_v16, %v29_v10  ;;  %v110_v23 = vmul.f32 %v105_v17, %v101_v11 }
   0x9   :  { %v462_v29 = vmul.f32 %v454_v19, %v451_v18  ;;  %v490_v16 = vmul.f32 %v437_v7, %v105_v17 }
   0xa   :  { %v20_v24 = vrot.slane %v19_v20, 1  ;;  %v26_v25 = vrot.slane %v25_v21, 1  ;;  %v32_v26 = vrot.slane %v31_v22, 1  ;;  %v114_v27 = vmul.f32 %v110_v23, %v451_v18 }
   0xb   :  { %v458_v28 = vmul.f32 %v447_v13, %v110_v23  ;;  %v177_v23 = vmul.f32 %v462_v29, %v421_v0 }
   0xc   :  { %v464_v30 = vadd.f32 %v20_v24, %v19_v20  ;;  %v466_v31 = vadd.f32 %v26_v25, %v25_v21  ;;  %v468_v32 = vadd.f32 %v32_v26, %v31_v22  ;;  %v115_v33 = vrot.slane %v114_v27, 4 }
   0xd   :  { %v121_v34 = vmul.f32 %v114_v27, %v421_v0  ;;  %v128_v35 = vmul.f32 %v426_v1, %v114_v27  ;;  %v135_v36 = vmul.f32 %v431_v2, %v114_v27  ;;  %v143_v37 = vrot.slane %v458_v28, 4 }
   0xe   :  { %v34_v38 = vmul.f32 0.125, %v464_v30  ;;  %v35_v39 = vmul.f32 0.125, %v466_v31  ;;  %v36_v40 = vmul.f32 0.125, %v468_v32  ;;  %v116_v41 = vadd.f32 %v115_v33, %v114_v27 }
   0xf   :  { %v122_v42 = vrot.slane %v121_v34, 4  ;;  %v129_v43 = vrot.slane %v128_v35, 4  ;;  %v136_v44 = vrot.slane %v135_v36, 4  ;;  %v144_v45 = vadd.f32 %v143_v37, %v458_v28 }
  0x10   :  { %v37_v46 = vsub.f32 %v421_v0, %v34_v38  ;;  %v53_v47 = vsub.f32 %v426_v1, %v35_v39  ;;  %v69_v48 = vsub.f32 %v431_v2, %v36_v40  ;;  %v117_v49 = vrot.slane %v116_v41, 2 }
  0x11   :  { %v123_v51 = vadd.f32 %v122_v42, %v121_v34  ;;  %v130_v52 = vadd.f32 %v129_v43, %v128_v35  ;;  %v137_v53 = vadd.f32 %v136_v44, %v135_v36  ;;  %v145_v54 = vrot.slane %v144_v45, 2 }
  0x12   :  { %v38_v55 = vmul.f32 %v37_v46, %v37_v46  ;;  %v54_v56 = vmul.f32 %v53_v47, %v53_v47  ;;  %v70_v57 = vmul.f32 %v69_v48, %v69_v48  ;;  %v118_v58 = vadd.f32 %v117_v49, %v116_v41 }
  0x13   :  { %v124_v59 = vrot.slane %v123_v51, 2  ;;  %v131_v60 = vrot.slane %v130_v52, 2  ;;  %v138_v61 = vrot.slane %v137_v53, 2  ;;  %v146_v62 = vadd.f32 %v145_v54, %v144_v45 }
  0x14   :  { %v39_v63 = vrot.slane %v38_v55, 4  ;;  %v55_v3 = vrot.slane %v54_v56, 4  ;;  %v71_v4 = vrot.slane %v70_v57, 4  ;;  %v119_v20 = vrot.slane %v118_v58, 1 }
  0x15   :  { %v125_v8 = vadd.f32 %v124_v59, %v123_v51  ;;  %v132_v9 = vadd.f32 %v131_v60, %v130_v52  ;;  %v139_v10 = vadd.f32 %v138_v61, %v137_v53  ;;  %v147_v21 = vrot.slane %v146_v62, 1 }
  0x16   :  { %v40_v11 = vadd.f32 %v39_v63, %v38_v55  ;;  %v56_v14 = vadd.f32 %v55_v3, %v54_v56  ;;  %v72_v15 = vadd.f32 %v71_v4, %v70_v57  ;;  %v171_v22 = vrot.slane %v462_v29, 4 }
  0x17   :  { %v149_v12 = vmul.f32 %v458_v28, %v421_v0  ;;  %v126_v27 = vrot.slane %v125_v8, 1  ;;  %v133_v33 = vrot.slane %v132_v9, 1  ;;  %v140_v34 = vrot.slane %v139_v10, 1 }
  0x18   :  { %v41_v24 = vrot.slane %v40_v11, 2  ;;  %v57_v25 = vrot.slane %v56_v14, 2  ;;  %v73_v26 = vrot.slane %v72_v15, 2  ;;  %v156_v7 = vmul.f32 %v426_v1, %v458_v28 }
  0x19   :  { %v150_v37 = vrot.slane %v149_v12, 4  ;;  %v163_v39 = vmul.f32 %v431_v2, %v458_v28  ;;  %v172_v40 = vadd.f32 %v171_v22, %v462_v29  ;;  %v178_v41 = vrot.slane %v177_v23, 4 }
  0x1a   :  { %v42_v17 = vadd.f32 %v41_v24, %v40_v11  ;;  %v58_v35 = vadd.f32 %v57_v25, %v56_v14  ;;  %v74_v36 = vadd.f32 %v73_v26, %v72_v15  ;;  %v157_v38 = vrot.slane %v156_v7, 4 }
  0x1b   :  { %v151_v45 = vadd.f32 %v150_v37, %v149_v12  ;;  %v164_v47 = vrot.slane %v163_v39, 4  ;;  %v173_v48 = vrot.slane %v172_v40, 2  ;;  %v179_v49 = vadd.f32 %v178_v41, %v177_v23 }
  0x1c   :  { %v43_v42 = vrot.slane %v42_v17, 1  ;;  %v59_v43 = vrot.slane %v58_v35, 1  ;;  %v75_v44 = vrot.slane %v74_v36, 1  ;;  %v158_v46 = vadd.f32 %v157_v38, %v156_v7 }
  0x1d   :  { %v152_v54 = vrot.slane %v151_v45, 2  ;;  %v165_v56 = vadd.f32 %v164_v47, %v163_v39  ;;  %v174_v57 = vadd.f32 %v173_v48, %v172_v40  ;;  %v180_v59 = vrot.slane %v179_v49, 2 }
  0x1e   :  { %v44_v51 = vadd.f32 %v43_v42, %v42_v17  ;;  %v60_v52 = vadd.f32 %v59_v43, %v58_v35  ;;  %v76_v53 = vadd.f32 %v75_v44, %v74_v36  ;;  %v159_v55 = vrot.slane %v158_v46, 2 }
  0x1f   :  { %v198_v63 = vmul.f32 %v447_v13, %v454_v19  ;;  %v510_v3 = vadd.f32 %v119_v20, %v118_v58  ;;  %v153_v4 = vadd.f32 %v152_v54, %v151_v45  ;;  %v184_v11 = vmul.f32 %v426_v1, %v462_v29 }
  0x20   :  { %v502_v28 = vmul.f32 0.14285715, %v44_v51  ;;  %v504_v60 = vmul.f32 0.14285715, %v60_v52  ;;  %v506_v61 = vmul.f32 0.14285715, %v76_v53  ;;  %v515_v14 = vmul.f32 %v113_v6, %v451_v18 }
  0x21   :  { %v518_v15 = vadd.f32 %v126_v27, %v125_v8  ;;  %v520_v22 = vadd.f32 %v133_v33, %v132_v9  ;;  %v522_v23 = vadd.f32 %v147_v21, %v146_v62  ;;  %v160_v19 = vadd.f32 %v159_v55, %v158_v46 }
  0x22   :  { %394 = vrsqrt.f32 %v502_v28  ;;  %v166_v58 = vrot.slane %v165_v56, 2  ;;  %v175_v20 = vrot.slane %v174_v57, 1  ;;  %vm48_vm3 = vcmp.eq.f32.partialorder %v502_v28, inf }
  0x23   :  { %396 = vrsqrt.f32 %v504_v60  ;;  %v527_v24 = vadd.f32 %v140_v34, %v139_v10  ;;  %v181_v6 = vadd.f32 %v180_v59, %v179_v49  ;;  %vm50_vm4 = vcmp.eq.f32.partialorder %v502_v28, 0.0 }
  0x24   :  { %398 = vrsqrt.f32 %v506_v61  ;;  %v51_v8 = vand.u32 2147483648, %v502_v28  ;;  %vm64_vm5 = vcmp.eq.f32.partialorder %v504_v60, inf  ;;  %v67_v62 = vand.u32 2147483648, %v504_v60 }
  0x25   :  { %v154_v9 = vrot.slane %v153_v4, 1  ;;  %vm66_vm6 = vcmp.eq.f32.partialorder %v504_v60, 0.0  ;;  %vm80_vm7 = vcmp.eq.f32.partialorder %v506_v61, inf  ;;  %v83_v21 = vand.u32 2147483648, %v506_v61 }
  0x26   :  { %v185_v25 = vrot.slane %v184_v11, 4  ;;  %v191_v10 = vmul.f32 %v431_v2, %v462_v29  ;;  %v199_v26 = vrot.slane %v198_v63, 4  ;;  %vm82_vm8 = vcmp.eq.f32.partialorder %v506_v61, 0.0 }
  0x27   :  { %v161_v12 = vrot.slane %v160_v19, 1  ;;  %v167_v27 = vadd.f32 %v166_v58, %v165_v56  ;;  %v539_v33 = vadd.f32 %v175_v20, %v174_v57  ;;  %v205_v34 = vmul.f32 %v198_v63, %v421_v0 }
  0x28   :  { %v182_v7 = vrot.slane %v181_v6, 1  ;;  %v186_v17 = vadd.f32 %v185_v25, %v184_v11  ;;  %v192_v35 = vrot.slane %v191_v10, 4  ;;  %v200_v36 = vadd.f32 %v199_v26, %v198_v63 }
  0x29   :  { %v542_v37 = vadd.f32 %v154_v9, %v153_v4  ;;  %v206_v38 = vrot.slane %v205_v34, 4  ;;  %v212_v39 = vmul.f32 %v426_v1, %v198_v63  ;;  %v219_v29 = vmul.f32 %v431_v2, %v198_v63 }
  0x2a   :  { %v187_v40 = vrot.slane %v186_v17, 2  ;;  %v193_v41 = vadd.f32 %v192_v35, %v191_v10  ;;  %v201_v42 = vrot.slane %v200_v36, 2  ;;  %v226_v43 = vmul.f32 %v490_v16, %v451_v18 }
  0x2b   :  { %v548_v44 = vadd.f32 %v161_v12, %v160_v19  ;;  %v207_v45 = vadd.f32 %v206_v38, %v205_v34  ;;  %v213_v46 = vrot.slane %v212_v39, 4  ;;  %v220_v47 = vrot.slane %v219_v29, 4 }
  0x2c   :  { %v395_v48 = vpop.eup %394  ;;  %v168_v49 = vrot.slane %v167_v27, 1  ;;  %v188_v51 = vadd.f32 %v187_v40, %v186_v17  ;;  %v194_v52 = vrot.slane %v193_v41, 2  ;;  %v202_v53 = vadd.f32 %v201_v42, %v200_v36 }
  0x2d   :  { %v397_v54 = vpop.eup %396  ;;  %v47_v55 = vmul.f32 %v395_v48, %v502_v28  ;;  %v551_v56 = vadd.f32 %v182_v7, %v181_v6  ;;  %v208_v57 = vrot.slane %v207_v45, 2  ;;  %v214_v59 = vadd.f32 %v213_v46, %v212_v39 }
  0x2e   :  { %v399_v18 = vpop.eup %398  ;;  %v63_v63 = vmul.f32 %v397_v54, %v504_v60  ;;  %v189_v4 = vrot.slane %v188_v51, 1  ;;  %v195_v11 = vadd.f32 %v194_v52, %v193_v41  ;;  %v227_v19 = vrot.slane %v226_v43, 4 }
  0x2f   :  { %v49_v58 = vsel %vm48_vm3, %v502_v28, %v47_v55  ;;  %v79_v20 = vmul.f32 %v399_v18, %v506_v61  ;;  %v203_v9 = vrot.slane %v202_v53, 1  ;;  %v221_v25 = vadd.f32 %v220_v47, %v219_v29 }
  0x30   :  { %v52_v6 = vsel %vm50_vm4, %v51_v8, %v49_v58  ;;  %v65_v10 = vsel %vm64_vm5, %v504_v60, %v63_v63  ;;  %v563_v26 = vadd.f32 %v168_v49, %v167_v27  ;;  %v215_v12 = vrot.slane %v214_v59, 2 }
  0x31   :  { %v68_v34 = vsel %vm66_vm6, %v67_v62, %v65_v10  ;;  %v81_v7 = vsel %vm80_vm7, %v506_v61, %v79_v20  ;;  %v209_v17 = vadd.f32 %v208_v57, %v207_v45  ;;  %v254_v35 = vmul.f32 %v447_v13, %v490_v16 }
  0x32   :  { %v84_v28 = vsel %vm82_vm8, %v83_v21, %v81_v7  ;;  %v90_v8 = vsel %vm89_vm9, %v52_v6, %v68_v34  ;;  %v575_v36 = vadd.f32 %v189_v4, %v188_v51  ;;  %v196_v27 = vrot.slane %v195_v11, 1 }
  0x33   :  { %v92_v38 = vsel %vm91_vm10, %v90_v8, %v84_v28  ;;  %v578_v60 = vadd.f32 %v203_v9, %v202_v53  ;;  %v222_v62 = vrot.slane %v221_v25, 2  ;;  %v228_v39 = vadd.f32 %v227_v19, %v226_v43 }
  0x34   :  { %v94_v29 = vsel %vm93_vm11, %v92_v38, %v87_v5  ;;  %v216_v40 = vadd.f32 %v215_v12, %v214_v59  ;;  %v233_v13 = vmul.f32 %v226_v43, %v421_v0  ;;  %v240_v16 = vmul.f32 %v426_v1, %v226_v43 }
  0x35   :  { %v96_v61 = vsel %vm95_vm12, %v94_v29, 0.0  ;;  %v223_v21 = vadd.f32 %v222_v62, %v221_v25  ;;  %v229_v41 = vrot.slane %v228_v39, 2  ;;  %v247_v42 = vmul.f32 %v431_v2, %v226_v43 }
  0x36   :  { %97 = vst [vmem:[%s695_s2] sm:$0xff] %v96_v61  ;;  %v210_v45 = vrot.slane %v209_v17, 1  ;;  %v234_v46 = vrot.slane %v233_v13, 4  ;;  %v241_v50 = vrot.slane %v240_v16, 4  ;;  %v255_v47 = vrot.slane %v254_v35, 4 }
  0x37   :  { %v590_v5 = vadd.f32 %v196_v27, %v195_v11  ;;  %v230_v48 = vadd.f32 %v229_v41, %v228_v39  ;;  %v248_v49 = vrot.slane %v247_v42, 4  ;;  %v261_v51 = vmul.f32 %v254_v35, %v421_v0 }
  0x38   :  { %v235_v52 = vadd.f32 %v234_v46, %v233_v13  ;;  %v242_v53 = vadd.f32 %v241_v50, %v240_v16  ;;  %v256_v54 = vadd.f32 %v255_v47, %v254_v35  ;;  %v268_v55 = vmul.f32 %v426_v1, %v254_v35 }
  0x39   :  { %v217_v43 = vrot.slane %v216_v40, 1  ;;  %v224_v57 = vrot.slane %v223_v21, 1  ;;  %v249_v59 = vadd.f32 %v248_v49, %v247_v42  ;;  %v262_v18 = vrot.slane %v261_v51, 4 }
  0x3a   :  { %v236_v63 = vrot.slane %v235_v52, 2  ;;  %v243_v4 = vrot.slane %v242_v53, 2  ;;  %v257_v19 = vrot.slane %v256_v54, 2  ;;  %v269_v58 = vrot.slane %v268_v55, 4 }
  0x3b   :  { %v231_v20 = vrot.slane %v230_v48, 1  ;;  %v250_v11 = vrot.slane %v249_v59, 2  ;;  %v263_v9 = vadd.f32 %v262_v18, %v261_v51  ;;  %v275_v25 = vmul.f32 %v431_v2, %v254_v35 }
  0x3c   :  { %v237_v6 = vadd.f32 %v236_v63, %v235_v52  ;;  %v244_v10 = vadd.f32 %v243_v4, %v242_v53  ;;  %v258_v12 = vadd.f32 %v257_v19, %v256_v54  ;;  %v270_v34 = vadd.f32 %v269_v58, %v268_v55 }
  0x3d   :  { %v251_v7 = vadd.f32 %v250_v11, %v249_v59  ;;  %v264_v28 = vrot.slane %v263_v9, 2  ;;  %v276_v8 = vrot.slane %v275_v25, 4  ;;  %v283_v27 = vrot.slane %v515_v14, 4 }
  0x3e   :  { %v596_v38 = vadd.f32 %v210_v45, %v209_v17  ;;  %v238_v62 = vrot.slane %v237_v6, 1  ;;  %v245_v39 = vrot.slane %v244_v10, 1  ;;  %v271_v29 = vrot.slane %v270_v34, 2 }
  0x3f   :  { %v598_v13 = vadd.f32 %v217_v43, %v216_v40  ;;  %v259_v16 = vrot.slane %v258_v12, 1  ;;  %v277_v61 = vadd.f32 %v276_v8, %v275_v25  ;;  %v284_v35 = vadd.f32 %v283_v27, %v515_v14 }
  0x40   :  { %v601_v41 = vadd.f32 %v224_v57, %v223_v21  ;;  %v603_v42 = vadd.f32 %v231_v20, %v230_v48  ;;  %v252_v46 = vrot.slane %v251_v7, 1  ;;  %v265_v50 = vadd.f32 %v264_v28, %v263_v9 }
  0x41   :  { %v605_v47 = vadd.f32 %v238_v62, %v237_v6  ;;  %v272_v49 = vadd.f32 %v271_v29, %v270_v34  ;;  %v278_v17 = vrot.slane %v277_v61, 2  ;;  %v285_v45 = vrot.slane %v284_v35, 2 }
  0x42   :  { %v607_v51 = vadd.f32 %v245_v39, %v244_v10  ;;  %v289_v40 = vmul.f32 %v515_v14, %v421_v0  ;;  %v296_v52 = vmul.f32 %v426_v1, %v515_v14  ;;  %v303_v21 = vmul.f32 %v431_v2, %v515_v14 }
  0x43   :  { %v260_v48 = vadd.f32 %v259_v16, %v258_v12  ;;  %v279_v53 = vadd.f32 %v278_v17, %v277_v61  ;;  %v286_v54 = vadd.f32 %v285_v45, %v284_v35  ;;  %v311_v55 = vadd.f32 %v522_v23, %v510_v3 }
  0x44   :  { %v266_v43 = vrot.slane %v265_v50, 1  ;;  %v290_v57 = vrot.slane %v289_v40, 4  ;;  %v297_v59 = vrot.slane %v296_v52, 4  ;;  %v304_v18 = vrot.slane %v303_v21, 4 }
  0x45   :  { %v273_v63 = vrot.slane %v272_v49, 1  ;;  %v287_v4 = vrot.slane %v286_v54, 1  ;;  %v312_v0 = vadd.f32 %v311_v55, %v539_v33  ;;  %v319_v1 = vadd.f32 %v542_v37, %v518_v15 }
  0x46   :  { %v291_v2 = vadd.f32 %v290_v57, %v289_v40  ;;  %v298_v14 = vadd.f32 %v297_v59, %v296_v52  ;;  %v305_v19 = vadd.f32 %v304_v18, %v303_v21  ;;  %v327_v58 = vadd.f32 %v548_v44, %v520_v22 }
  0x47   :  { %v280_v20 = vrot.slane %v279_v53, 1  ;;  %v288_v11 = vadd.f32 %v287_v4, %v286_v54  ;;  %v313_v9 = vadd.f32 %v312_v0, %v578_v60  ;;  %v320_v25 = vadd.f32 %v319_v1, %v551_v56 }
  0x48   :  { %v292_v6 = vrot.slane %v291_v2, 2  ;;  %v299_v10 = vrot.slane %v298_v14, 2  ;;  %v306_v12 = vrot.slane %v305_v19, 2  ;;  %v328_v34 = vadd.f32 %v327_v58, %v575_v36 }
  0x49   :  { %v314_v28 = vadd.f32 %v313_v9, %v603_v42  ;;  %v321_v8 = vadd.f32 %v320_v25, %v596_v38  ;;  %v335_v27 = vadd.f32 %v563_v26, %v527_v24  ;;  %v342_v62 = vsel %vm89_vm9, %v510_v3, %v522_v23 }
  0x4a   :  { %v293_v39 = vadd.f32 %v292_v6, %v291_v2  ;;  %v300_v29 = vadd.f32 %v299_v10, %v298_v14  ;;  %v307_v16 = vadd.f32 %v306_v12, %v305_v19  ;;  %v329_v61 = vadd.f32 %v328_v34, %v598_v13 }
  0x4b   :  { %v253_v35 = vadd.f32 %v252_v46, %v251_v7  ;;  %v315_v17 = vadd.f32 %v314_v28, %v260_v48  ;;  %v336_v45 = vadd.f32 %v335_v27, %v590_v5  ;;  %v343_v40 = vsel %vm91_vm10, %v342_v62, %v539_v33 }
  0x4c   :  { %v267_v52 = vadd.f32 %v266_v43, %v265_v50  ;;  %v294_v21 = vrot.slane %v293_v39, 1  ;;  %v301_v54 = vrot.slane %v300_v29, 1  ;;  %v322_v55 = vadd.f32 %v321_v8, %v605_v47 }
  0x4d   :  { %v308_v57 = vrot.slane %v307_v16, 1  ;;  %v316_v59 = vadd.f32 %v315_v17, %v288_v11  ;;  %v337_v3 = vadd.f32 %v336_v45, %v601_v41  ;;  %v344_v23 = vsel %vm93_vm11, %v343_v40, %v578_v60 }
  0x4e   :  { %v274_v18 = vadd.f32 %v273_v63, %v272_v49  ;;  %v281_v7 = vadd.f32 %v280_v20, %v279_v53  ;;  %v330_v46 = vadd.f32 %v329_v61, %v607_v51  ;;  %v346_v33 = vsel %vm345_vm13, %v344_v23, %v603_v42 }
  0x4f   :  { %v317_v4 = vsub.f32 8.0, %v316_v59  ;;  %v338_v0 = vadd.f32 %v337_v3, %v253_v35  ;;  %v357_v50 = vsel %vm89_vm9, %v518_v15, %v542_v37  ;;  %v295_v43 = vadd.f32 %v294_v21, %v293_v39 }
  0x50   :  { %v323_v1 = vadd.f32 %v322_v55, %v267_v52  ;;  %v348_v2 = vsel %vm347_vm14, %v346_v33, %v260_v48  ;;  %v358_v60 = vsel %vm91_vm10, %v357_v50, %v551_v56  ;;  %v302_v49 = vadd.f32 %v301_v54, %v300_v29 }
  0x51   :  { %v309_v53 = vadd.f32 %v308_v57, %v307_v16  ;;  %v349_v63 = vsel %vm95_vm12, %v348_v2, %v288_v11  ;;  %v366_v14 = vsel %vm89_vm9, %v520_v22, %v548_v44  ;;  %v331_v42 = vadd.f32 %v330_v46, %v274_v18 }
  0x52   :  { %v339_v19 = vadd.f32 %v338_v0, %v281_v7  ;;  %v351_v58 = vsel %vm350_vm15, %v349_v63, %v317_v4  ;;  %v359_v15 = vsel %vm93_vm11, %v358_v60, %v596_v38  ;;  %v367_v48 = vsel %vm91_vm10, %v366_v14, %v575_v36 }
  0x53   :  { %v353_v37 = vmax.f32 %v351_v58, 1.0  ;;  %v375_v56 = vsel %vm89_vm9, %v527_v24, %v563_v26  ;;  %v324_v20 = vadd.f32 %v323_v1, %v295_v43  ;;  %v360_v22 = vsel %vm345_vm13, %v359_v15, %v605_v47 }
  0x54   :  { %v368_v44 = vsel %vm93_vm11, %v367_v48, %v598_v13  ;;  %v332_v11 = vadd.f32 %v331_v42, %v302_v49  ;;  %v340_v9 = vadd.f32 %v339_v19, %v309_v53  ;;  %v376_v36 = vsel %vm91_vm10, %v375_v56, %v590_v5 }
  0x55   :  { %400 = vrcp.f32 %v353_v37  ;;  %v369_v38 = vsel %vm345_vm13, %v368_v44, %v607_v51  ;;  %v377_v25 = vsel %vm93_vm11, %v376_v36, %v601_v41  ;;  %v361_v24 = vsel %vm347_vm14, %v360_v22, %v267_v52 }
  0x56   :  { %v370_v26 = vsel %vm347_vm14, %v369_v38, %v274_v18  ;;  %v378_v47 = vsel %vm345_vm13, %v377_v25, %v253_v35  ;;  %v325_v13 = vsub.f32 %v464_v30, %v324_v20  ;;  %v333_v10 = vsub.f32 %v466_v31, %v332_v11 }
  0x57   :  { %v379_v6 = vsel %vm347_vm14, %v378_v47, %v281_v7  ;;  %v341_v51 = vsub.f32 %v468_v32, %v340_v9  ;;  %v362_v12 = vsel %vm95_vm12, %v361_v24, %v295_v43  ;;  %v371_v5 = vsel %vm95_vm12, %v370_v26, %v302_v49 }
  0x58   :  { %v380_v41 = vsel %vm95_vm12, %v379_v6, %v309_v53  ;;  %vm352_vm0 = vcmp.gt.f32.partialorder %v351_v58, 0.0  ;;  %v363_v34 = vsel %vm350_vm15, %v362_v12, %v325_v13  ;;  %v372_v28 = vsel %vm350_vm15, %v371_v5, %v333_v10 }
  0x59   :  { %v381_v8 = vsel %vm350_vm15, %v380_v41, %v341_v51 }
  0x5f   :  { %v401_v27 = vpop.eup %400 }
  0x60   :  { %v356_v62 = vsel %vm352_vm0, %v401_v27, 0.0 }
  0x61   :  { %v364_v30 = vmul.f32 %v363_v34, %v356_v62  ;;  %v373_v39 = vmul.f32 %v372_v28, %v356_v62  ;;  %v382_v31 = vmul.f32 %v381_v8, %v356_v62 }
  0x63   :  { %365 = vst [vmem:[%s695_s2 + $0x8] sm:$0xff] %v364_v30  ;;  %374 = vst [vmem:[%s695_s2 + $0x10] sm:$0xff] %v373_v39 }
  0x64   :  { %383 = vst [vmem:[%s695_s2 + $0x18] sm:$0xff] %v382_v31 }

</bundles_post_ra>
